<compile_context>
chip_gen: v7x
topology: tpu7x:2x2x1
jax: 0.10.0
libtpu: 0.0.40
codegen_flags: <defaults>
</compile_context>

<pallas_src>
import jax
import jax.numpy as jnp
from jax import lax
from jax.experimental import pallas as pl
from jax.experimental.pallas import tpu as pltpu


def _ce_rows(logits_f32, tgt_i32):
    """Per-row cross entropy (stable log-softmax). logits (TN,C) f32, tgt (TN,1) i32."""
    m = jnp.max(logits_f32, axis=1, keepdims=True)                               # (TN,1)
    lse = m + jnp.log(jnp.sum(jnp.exp(logits_f32 - m), axis=1, keepdims=True))   # (TN,1)
    col = lax.broadcasted_iota(jnp.int32, logits_f32.shape, 1)                   # (TN,C)
    picked = jnp.sum(jnp.where(col == tgt_i32, logits_f32, 0.0),
                     axis=1, keepdims=True)                                      # (TN,1)
    return lse - picked                                                          # (TN,1)


def _make_loss_kernel(n_rows, tn, is_vae):
    """Builds the tiled loss kernel. n_rows / tn are Python ints (trace-time consts)."""

    def kernel(*refs):
        if is_vae:
            y_ref, tgt_ref, mu_ref, lv_ref, out_ref, acc_ref = refs
        else:
            y_ref, tgt_ref, out_ref, acc_ref = refs

        i = pl.program_id(0)

        @pl.when(i == 0)
        def _():
            acc_ref[0] = jnp.float32(0.0)

        # Cast on load (inputs arrive in native dtype, e.g. bf16).
        logits = y_ref[...].astype(jnp.float32)
        tgt = tgt_ref[...]

        ce = _ce_rows(logits, tgt)                                               # (TN,1)

        # Mask rows of a partial last tile out of the sums.
        row = i * tn + lax.broadcasted_iota(jnp.int32, (tn, 1), 0)               # (TN,1)
        valid = row < n_rows
        tile_sum = jnp.sum(jnp.where(valid, ce, 0.0))

        if is_vae:
            mu = mu_ref[...].astype(jnp.float32)
            lv = lv_ref[...].astype(jnp.float32)
            kld_rows = jnp.sum(1.0 + lv - mu * mu - jnp.exp(lv),
                               axis=1, keepdims=True)                            # (TN,1)
            tile_sum = tile_sum + (-0.5) * jnp.sum(jnp.where(valid, kld_rows, 0.0))

        acc_ref[0] = acc_ref[0] + tile_sum

        @pl.when(i == pl.num_programs(0) - 1)
        def _():
            out_ref[0, 0] = acc_ref[0] / jnp.float32(n_rows)

    return kernel


def _pick_tile_rows(n, c, d):
    """Pick TN so native double-buffered tiles + f32 intermediates fit scoped VMEM."""
    budget = 4 * 1024 * 1024                       # single-buffer budget for the y tile
    bytes_per_row = max(1, (c + max(d, 1)) * 4)    # conservative: assume f32 rows
    tn = budget // bytes_per_row
    tn = max(8, min(2048, (tn // 8) * 8))
    if n <= tn:
        return n                                   # single full-array block
    return tn


class AutoEncoderGenericPallas:
    """Pallas port of AutoEncoderGeneric with main_loss = CrossEntropyLoss()."""

    def __init__(self, is_vae_model: bool = False):
        self._is_vae_model = is_vae_model

    def __call__(self, y, target, mu=None, log_var=None, tile_rows=None):
        n, c = y.shape
        d = mu.shape[1] if (self._is_vae_model and mu is not None) else 1
        tgt = target.reshape(-1, 1).astype(jnp.int32)

        tn = tile_rows if tile_rows is not None else _pick_tile_rows(n, c, d)
        tn = min(tn, n)
        grid = (pl.cdiv(n, tn),)

        y_spec = pl.BlockSpec((tn, c), lambda i: (i, 0))
        t_spec = pl.BlockSpec((tn, 1), lambda i: (i, 0))
        out_spec = pl.BlockSpec((1, 1), lambda i: (0, 0),
                                memory_space=pltpu.MemorySpace.SMEM)
        out_shape = jax.ShapeDtypeStruct((1, 1), jnp.float32)
        scratch = [pltpu.SMEM((1,), jnp.float32)]
        params = pltpu.CompilerParams(dimension_semantics=("arbitrary",),
                                      vmem_limit_bytes=32 << 20)

        if not self._is_vae_model:
            kernel = _make_loss_kernel(n, tn, is_vae=False)
            res = pl.pallas_call(
                kernel,
                out_shape=out_shape,
                grid=grid,
                in_specs=[y_spec, t_spec],
                out_specs=out_spec,
                scratch_shapes=scratch,
                compiler_params=params,
            )(y, tgt)
            return res[0, 0]

        m_spec = pl.BlockSpec((tn, d), lambda i: (i, 0))
        kernel = _make_loss_kernel(n, tn, is_vae=True)
        res = pl.pallas_call(
            kernel,
            out_shape=out_shape,
            grid=grid,
            in_specs=[y_spec, t_spec, m_spec, m_spec],
            out_specs=out_spec,
            scratch_shapes=scratch,
            compiler_params=params,
        )(y, tgt, mu, log_var)
        return res[0, 0]


def _reference(y, target, mu=None, log_var=None, is_vae=False):
    """Pure-JAX reference matching PyTorch semantics (f32 math)."""
    logp = jax.nn.log_softmax(y.astype(jnp.float32), axis=1)
    ce = -jnp.mean(jnp.take_along_axis(logp, target.reshape(-1, 1), axis=1))
    if not is_vae:
        return ce
    mu = mu.astype(jnp.float32)
    log_var = log_var.astype(jnp.float32)
    kld = -0.5 * jnp.mean(jnp.sum(1.0 + log_var - mu**2 - jnp.exp(log_var), axis=1))
    return ce + kld


if __name__ == "__main__":
    key = jax.random.PRNGKey(0)
    k_y, k_t, k_mu, k_lv = jax.random.split(key, 4)

    # ---- small shapes, single-tile path -------------------------------------
    N, C, D = 8, 32, 16
    y = jax.random.normal(k_y, (N, C), dtype=jnp.float32)
    target = jax.random.randint(k_t, (N,), 0, C, dtype=jnp.int32)
    mu = jax.random.normal(k_mu, (N, D), dtype=jnp.float32) * 0.5
    log_var = jax.random.normal(k_lv, (N, D), dtype=jnp.float32) * 0.1

    loss_ce = AutoEncoderGenericPallas(is_vae_model=False)(y, target)
    jax.block_until_ready(loss_ce)
    ref_ce = _reference(y, target, is_vae=False)
    assert jnp.allclose(loss_ce, ref_ce, rtol=1e-5, atol=1e-5), (loss_ce, ref_ce)

    loss_vae = AutoEncoderGenericPallas(is_vae_model=True)(y, target, mu, log_var)
    jax.block_until_ready(loss_vae)
    ref_vae = _reference(y, target, mu, log_var, is_vae=True)
    assert jnp.allclose(loss_vae, ref_vae, rtol=1e-5, atol=1e-5), (loss_vae, ref_vae)

    # ---- multi-tile path with a partial (masked) last tile ------------------
    N2 = 20  # 3 tiles of 8 rows, last tile has 4 garbage rows that must be masked
    ky2, kt2, km2, kl2 = jax.random.split(jax.random.PRNGKey(1), 4)
    y2 = jax.random.normal(ky2, (N2, C), dtype=jnp.float32)
    t2 = jax.random.randint(kt2, (N2,), 0, C, dtype=jnp.int32)
    mu2 = jax.random.normal(km2, (N2, D), dtype=jnp.float32) * 0.5
    lv2 = jax.random.normal(kl2, (N2, D), dtype=jnp.float32) * 0.1

    loss_vae2 = AutoEncoderGenericPallas(is_vae_model=True)(y2, t2, mu2, lv2,
                                                            tile_rows=8)
    jax.block_until_ready(loss_vae2)
    assert jnp.allclose(loss_vae2, _reference(y2, t2, mu2, lv2, is_vae=True),
                        rtol=1e-5, atol=1e-5)

    # ---- native bf16 inputs (no wrapper up-cast; cast happens in-kernel) ----
    y_bf = y.astype(jnp.bfloat16)
    mu_bf = mu.astype(jnp.bfloat16)
    lv_bf = log_var.astype(jnp.bfloat16)
    loss_bf = AutoEncoderGenericPallas(is_vae_model=True)(y_bf, target, mu_bf, lv_bf)
    jax.block_until_ready(loss_bf)
    ref_bf = _reference(y_bf, target, mu_bf, lv_bf, is_vae=True)
    assert jnp.allclose(loss_bf, ref_bf, rtol=5e-2, atol=5e-2), (loss_bf, ref_bf)

    print("KERNEL_OK")
</pallas_src>

<mosaic_0001>
module attributes {stable_mosaic.version = 11 : i64} {
  func.func @kernel(%arg0: i32, %arg1: memref<8x32xf32, #tpu.memory_space<vmem>>, %arg2: memref<8x1xi32, #tpu.memory_space<vmem>>, %arg3: memref<1x1xf32, #tpu.memory_space<smem>>, %arg4: memref<1xf32, #tpu.memory_space<smem>>) attributes {dimension_semantics = [#tpu.dimension_semantics<arbitrary>], iteration_bounds = array<i64: 1>, scalar_prefetch = 0 : i64, scratch_operands = 1 : i64, tpu.core_type = #tpu.core_type<tc>, window_params = [{transform_indices = @transform_0, window_bounds = array<i64: 8, 32>}, {transform_indices = @transform_1, window_bounds = array<i64: 8, 1>}, {transform_indices = @transform_2, window_bounds = array<i64: 1, 1>}]} {
    %c0_i32 = arith.constant 0 : i32
    %0 = arith.cmpi eq, %arg0, %c0_i32 : i32
    %1 = arith.extui %0 : i1 to i32
    %c0_i32_0 = arith.constant 0 : i32
    %2 = arith.cmpi ne, %1, %c0_i32_0 : i32
    scf.if %2 {
      %cst_14 = arith.constant 0.000000e+00 : f32
      %c0_15 = arith.constant 0 : index
      %40 = memref.load %arg4[%c0_15] : memref<1xf32, #tpu.memory_space<smem>>
      memref.store %cst_14, %arg4[%c0_15] : memref<1xf32, #tpu.memory_space<smem>>
    } else {
    }
    %c0 = arith.constant 0 : index
    %c0_1 = arith.constant 0 : index
    %3 = vector.load %arg1[%c0, %c0_1] : memref<8x32xf32, #tpu.memory_space<vmem>>, vector<8x32xf32>
    %c0_2 = arith.constant 0 : index
    %c0_3 = arith.constant 0 : index
    %4 = vector.load %arg2[%c0_2, %c0_3] : memref<8x1xi32, #tpu.memory_space<vmem>>, vector<8x1xi32>
    %cst = arith.constant dense<0xFF800000> : vector<8xf32>
    %5 = vector.multi_reduction <maximumf>, %3, %cst [1] : vector<8x32xf32> to vector<8xf32>
    %6 = vector.shape_cast %5 : vector<8xf32> to vector<8x1xf32>
    %7 = vector.broadcast %6 : vector<8x1xf32> to vector<8x32xf32>
    %8 = arith.subf %3, %7 : vector<8x32xf32>
    %9 = math.exp %8 : vector<8x32xf32>
    %cst_4 = arith.constant dense<0.000000e+00> : vector<8xf32>
    %10 = vector.multi_reduction <add>, %9, %cst_4 [1] : vector<8x32xf32> to vector<8xf32>
    %11 = vector.shape_cast %10 : vector<8xf32> to vector<8x1xf32>
    %12 = math.log %11 : vector<8x1xf32>
    %13 = arith.addf %6, %12 : vector<8x1xf32>
    %14 = tpu.iota {dimensions = array<i32: 1>} : vector<8x32xi32>
    %15 = vector.broadcast %4 : vector<8x1xi32> to vector<8x32xi32>
    %16 = arith.cmpi eq, %14, %15 : vector<8x32xi32>
    %cst_5 = arith.constant 0.000000e+00 : f32
    %17 = vector.broadcast %cst_5 : f32 to vector<8x32xf32>
    %18 = arith.select %16, %3, %17 : vector<8x32xi1>, vector<8x32xf32>
    %cst_6 = arith.constant dense<0.000000e+00> : vector<8xf32>
    %19 = vector.multi_reduction <add>, %18, %cst_6 [1] : vector<8x32xf32> to vector<8xf32>
    %20 = vector.shape_cast %19 : vector<8xf32> to vector<8x1xf32>
    %21 = arith.subf %13, %20 : vector<8x1xf32>
    %c8_i32 = arith.constant 8 : i32
    %22 = arith.muli %arg0, %c8_i32 : i32
    %23 = tpu.iota {dimensions = array<i32: 0>} : vector<8x1xi32>
    %24 = vector.broadcast %22 : i32 to vector<8x1xi32>
    %25 = arith.addi %24, %23 : vector<8x1xi32>
    %c8_i32_7 = arith.constant 8 : i32
    %26 = vector.broadcast %c8_i32_7 : i32 to vector<8x1xi32>
    %27 = arith.cmpi slt, %25, %26 : vector<8x1xi32>
    %cst_8 = arith.constant 0.000000e+00 : f32
    %28 = vector.broadcast %cst_8 : f32 to vector<8x1xf32>
    %29 = arith.select %27, %21, %28 : vector<8x1xi1>, vector<8x1xf32>
    %30 = vector.shape_cast %29 : vector<8x1xf32> to vector<1x8x1xf32>
    %cst_9 = arith.constant dense<0.000000e+00> : vector<1xf32>
    %31 = vector.multi_reduction <add>, %30, %cst_9 [1, 2] : vector<1x8x1xf32> to vector<1xf32>
    %32 = vector.shape_cast %31 : vector<1xf32> to vector<1x1x1xf32>
    %33 = vector.extract %32[0, 0, 0] : f32 from vector<1x1x1xf32>
    %c0_10 = arith.constant 0 : index
    %34 = memref.load %arg4[%c0_10] : memref<1xf32, #tpu.memory_space<smem>>
    %35 = arith.addf %34, %33 : f32
    %c0_11 = arith.constant 0 : index
    %36 = memref.load %arg4[%c0_11] : memref<1xf32, #tpu.memory_space<smem>>
    memref.store %35, %arg4[%c0_11] : memref<1xf32, #tpu.memory_space<smem>>
    %c0_i32_12 = arith.constant 0 : i32
    %37 = arith.cmpi eq, %arg0, %c0_i32_12 : i32
    %38 = arith.extui %37 : i1 to i32
    %c0_i32_13 = arith.constant 0 : i32
    %39 = arith.cmpi ne, %38, %c0_i32_13 : i32
    scf.if %39 {
      %c0_14 = arith.constant 0 : index
      %40 = memref.load %arg4[%c0_14] : memref<1xf32, #tpu.memory_space<smem>>
      %cst_15 = arith.constant 8.000000e+00 : f32
      %41 = arith.divf %40, %cst_15 : f32
      %c0_16 = arith.constant 0 : index
      %c0_17 = arith.constant 0 : index
      %42 = memref.load %arg3[%c0_16, %c0_17] : memref<1x1xf32, #tpu.memory_space<smem>>
      memref.store %41, %arg3[%c0_16, %c0_17] : memref<1x1xf32, #tpu.memory_space<smem>>
    } else {
    }
    return
  }
  func.func @transform_0(%arg0: i32) -> (i32, i32) {
    %c0_i32 = arith.constant 0 : i32
    %c0_i32_0 = arith.constant 0 : i32
    return %arg0, %c0_i32 : i32, i32
  }
  func.func @transform_1(%arg0: i32) -> (i32, i32) {
    %c0_i32 = arith.constant 0 : i32
    %c0_i32_0 = arith.constant 0 : i32
    return %arg0, %c0_i32 : i32, i32
  }
  func.func @transform_2(%arg0: i32) -> (i32, i32) {
    %c0_i32 = arith.constant 0 : i32
    %c0_i32_0 = arith.constant 0 : i32
    %c0_i32_1 = arith.constant 0 : i32
    return %c0_i32, %c0_i32_0 : i32, i32
  }
}

</mosaic_0001>

<bundles_post_ra>
// kernel: tpu_custom_call.1
= control target key start
LH: loop header
LB: loop body
LE: loop exit
PB: predicated region body
PF: predicated region fallthrough
CT: control target
= control target key end

     0   :  { %vm20_vm0 = vcmask 261120   ;;  %s147_s0 = inlined_call_operand.vmem [shape: f32[8,32], index: 0, kind: input, shape index: {}]   ;;  %s148_s1 = inlined_call_operand.vmem [shape: s32[8,1], index: 1, kind: input, shape index: {}]   ;;  %s149_s2 = inlined_call_operand.hbm [shape: f32[1,1], index: 2, kind: output, shape index: {}]  }
   0x1   :  { %v18_v0 = vld [vmem:[%s147_s0] sm:$0xff] }
   0x2   :  { %7 = vsyncpa [#allocation4], 0  ;;  %v21_v1 = vsel %vm20_vm0, %v18_v0, -inf  ;;  %v109_v2 = vmov 0   ;;  %v19_v3 = vld [vmem:[%s148_s1] sm:$0xff]  ;;  %v33_v7 = vlaneseq  ;;  %vm51_vm2 = vcmask 7168  }
   0x3   :  { %92 = vset.pattern.permute.xlu0 %v109_v2  ;;  %s97_s15 = scalar_lea.hbm %s149_s2, 16 }
   0x4   :  { %22 = vmax.xlane.f32.xlu0 %v21_v1  ;;  %v34_v8 = vand.u32 127, %v33_v7  ;;  %p98_p0 = scmp.ne.s32.totalorder %s149_s2, %s97_s15  ;;  %p101_p1 = scmp.lt.u32.totalorder %s97_s15, %s149_s2 }
   0x6   :  { %p103_p2 = pnand %p101_p1, %p98_p0 }
  0x1a   :  { %36 = vperm.xlu0 %92, %v19_v3  }
  0x91   :  { %v23_v4 = vpop.xlane.xlu0 %22 }
  0x92   :  { %v24_v5 = vsub.f32 %v18_v0, %v23_v4 }
  0x94   :  { %v25_v6 = vmul.f32 1.442695, %v24_v5 }
  0x96   :  { %93 = vpow2.f32 %v25_v6 }
  0x99   :  { %v37_v9 = vpop.permute.xlu0 %36 }
  0x9a   :  { %vm38_vm1 = vcmp.eq.s32.totalorder %v34_v8, %v37_v9 }
  0x9b   :  { %v39_v11 = vsel %vm38_vm1, %v18_v0, 0.0 }
  0x9c   :  { %v40_v13 = vsel %vm20_vm0, %v39_v11, 0.0 }
  0xa0   :  { %v94_v10 = vpop.eup %93 }
  0xa1   :  { %v27_v12 = vsel %vm20_vm0, %v94_v10, 0.0 }
  0xa2   :  { %28 = vadd.xlane.f32.xlu1 %v27_v12 }
  0xa6   :  { %41 = vadd.xlane.f32.xlu1 %v40_v13 }
 0x12f   :  { %v29_v14 = vpop.xlane.xlu1 %28 }
 0x130   :  { %95 = vlog2.f32 %v29_v14 }
 0x133   :  { %v42_v17 = vpop.xlane.xlu1 %41 }
 0x13a   :  { %v96_v15 = vpop.eup %95 }
 0x13b   :  { %v31_v16 = vmul.f32 0.6931472, %v96_v15 }
 0x13d   :  { %v32_v18 = vadd.f32 %v31_v16, %v23_v4 }
 0x13f   :  { %v43_v19 = vsub.f32 %v32_v18, %v42_v17 }
 0x141   :  { %v52_v20 = vsel %vm51_vm2, %v43_v19, 0.0 }
 0x142   :  { %53 = vadd.xlane.f32.xlu1 %v52_v20 }
 0x1cf   :  { %v54_v21 = vpop.xlane.xlu1 %53 }
 0x1d0   :  { %v55_v22 = vrot.slane %v54_v21, 4 }
 0x1d2   :  { %v56_v23 = vadd.f32 %v55_v22, %v54_v21 }
 0x1d4   :  { %v57_v24 = vrot.slane %v56_v23, 2 }
 0x1d6   :  { %v58_v25 = vadd.f32 %v57_v24, %v56_v23 }
 0x1d8   :  { %v59_v26 = vrot.slane %v58_v25, 1 }
 0x1da   :  { %v60_v27 = vadd.f32 %v59_v26, %v58_v25 }
 0x1dc   :  { %88 = vpush %v60_v27 }
 0x20d   :  { %s89_s0 = spop %88 }
 0x20e   :  { %s72_s1 = smul.f32 0.125, %s89_s0 }
 0x210   :  { %74 = sst [smem:[#allocation3]] %s72_s1 }
 0x211   :  { %106 = shalt.err (!%p103_p2)
}
 0x212   :  { %s110_s20 = smov [#allocation3]  }
 0x213   :  { %82 = dma.smem_to_hbm %s110_s20, 16, %s149_s2, [#allocation4]  }
 0x214   :  { %107 = dma.done.wait [#allocation4], 16  }
 0x215   :  { %108 = vsyncadd [#allocation4], 4294967280 }
 0x216   :  { %86 = sfence }
 0x217   :  { %87 = vsyncpa [#allocation4], 1 }

</bundles_post_ra>
